<compile_context>
chip_gen: v5e
topology: v5e:2x2
jax: 0.10.0
libtpu: 0.0.40
codegen_flags: <defaults>
</compile_context>

<pallas_src>
import functools
import math

import jax
import jax.numpy as jnp
from jax.experimental import pallas as pl
from jax.experimental.pallas import tpu as pltpu


_NEG_BIG = -1e30               # exp(-1e30/tau - max) == 0; representable in f32/bf16
_TARGET_TILE_BYTES = 4 << 20   # ~4 MiB input tiles: measured HBM-roofline plateau


def _round_up(v, m):
    return (v + m - 1) // m * m


def _hw():
    """Per-generation VMEM budget for per-step footprint, vmem limit, TC count."""
    try:
        kind = jax.devices()[0].device_kind.lower()
    except Exception:
        kind = ""
    mib = 1 << 20
    if "v7" in kind:
        # 64 MiB physical VMEM per TensorCore, 2 TCs per chip.
        return {"tile_budget": 28 * mib, "vmem_limit": 48 * mib, "cores": 2}
    # v4 / v5e / v6e: 128 MiB physical VMEM, single TC. No need to chase the
    # full limit: efficiency plateaus well before it (leave headroom for XLA).
    return {"tile_budget": 40 * mib, "vmem_limit": 64 * mib, "cores": 1}


def _sublane_pack(dtype):
    itemsize = int(jnp.dtype(dtype).itemsize)
    return max(8, 32 // max(itemsize, 1))   # f32 -> 8, bf16 -> 16, i8/fp8 -> 32


# ----------------------------------------------------------------------------
# Kernels
# ----------------------------------------------------------------------------
def _fwd_kernel(x_ref, o_ref, *, inv_tau, hard, axis):
    # All math in f32 (required on v5e: no bf16 VPU/EUP).
    x = x_ref[...].astype(jnp.float32) * jnp.float32(inv_tau)
    m = jnp.max(x, axis=axis, keepdims=True)
    if hard:
        # One-hot of the row max, reusing `m` (no second argmax, no exp/sum);
        # first-index tie-break matches torch.max / jnp.argmax semantics.
        # Forward value of the straight-through estimator; its gradient is the
        # softmax backward, supplied by the custom_vjp below.
        n = x.shape[axis]
        iota = jax.lax.broadcasted_iota(jnp.int32, x.shape, axis % x.ndim)
        first = jnp.min(jnp.where(x == m, iota, n), axis=axis, keepdims=True)
        o_ref[...] = (iota == first).astype(o_ref.dtype)
    else:
        # Numerically-stable softmax along `axis`. exp(x - m) is recomputed
        # after the reduce so no full-tile exp stays live across the sum
        # (EUP has slack: this kernel is HBM-bandwidth-bound).
        s = jnp.sum(jnp.exp(x - m), axis=axis, keepdims=True)
        inv_s = pl.reciprocal(s, approx=False)   # exact: keeps 1e-5 tolerance
        o_ref[...] = (jnp.exp(x - m) * inv_s).astype(o_ref.dtype)


def _bwd_kernel(res_ref, g_ref, dx_ref, *, inv_tau, res_is_logits, axis):
    # Fused single-pass softmax backward: dx = (g - sum(g*alpha)) * alpha / tau.
    g = g_ref[...].astype(jnp.float32)
    if res_is_logits:
        # Hard path: residual is the logits; recompute alpha in-kernel.
        x = res_ref[...].astype(jnp.float32) * jnp.float32(inv_tau)
        m = jnp.max(x, axis=axis, keepdims=True)
        e = jnp.exp(x - m)
        alpha = e * pl.reciprocal(jnp.sum(e, axis=axis, keepdims=True), approx=False)
    else:
        # Soft path: residual is the forward output alpha (no recompute).
        alpha = res_ref[...].astype(jnp.float32)
    dot = jnp.sum(g * alpha, axis=axis, keepdims=True)
    dx_ref[...] = ((g - dot) * alpha * jnp.float32(inv_tau)).astype(dx_ref.dtype)


# ----------------------------------------------------------------------------
# pallas_call launcher (shared by fwd / bwd, lane-reduce and sublane-reduce)
# ----------------------------------------------------------------------------
def _launch(kernel, args, out_dtype, axis):
    shape = args[0].shape
    ndim = len(shape)
    axis_n = axis % ndim
    itemsize = max(int(jnp.dtype(a.dtype).itemsize) for a in args)
    hw = _hw()
    pack = _sublane_pack(args[0].dtype)
    n_io = len(args) + 1          # inputs + output, each double-buffered by Pallas
    f32_tmps = 4                  # live full-tile f32 temporaries inside the body
    min_steps = 2 * hw["cores"]   # >=2 steps/core: pipelining + cross-TC sharding

    if axis_n == ndim - 1:
        # 2-D (M, N): reduce over the lane axis.
        M, N = shape
        nphys = _round_up(N, 128)                       # physical VMEM lane width
        row_bytes_io = nphys * itemsize
        per_row = 2 * n_io * row_bytes_io + f32_tmps * nphys * 4
        tm = min(max(1, hw["tile_budget"] // per_row),
                 max(1, _TARGET_TILE_BYTES // row_bytes_io))
        tm = min(tm, _round_up(pl.cdiv(M, min_steps), pack))
        tm = max(pack, tm // pack * pack)
        tm = min(tm, _round_up(M, pack))
        # TODO(synk): for very large N an N-tiled online-softmax variant would
        # restore large row tiles; not needed for permutation-network sizes.
        grid = (pl.cdiv(M, tm),)
        block = (tm, N)
        index_map = lambda i: (i, 0)
        dims = ("parallel",)
    else:
        # 3-D (Mpre, N, L): reduce over the sublane axis (axis=-2); original
        # layout is kept, no HBM transpose.
        Mpre, N, L = shape
        nphys = _round_up(N, pack)
        max_lane = max(128, _TARGET_TILE_BYTES // (nphys * itemsize))
        tl = L if L <= max_lane else max(128, (max_lane // 128) * 128)
        lphys = _round_up(tl, 128)
        blk_io = nphys * lphys * itemsize
        per_blk = 2 * n_io * blk_io + f32_tmps * nphys * lphys * 4
        tb = max(1, min(max(1, hw["tile_budget"] // per_blk),
                        max(1, _TARGET_TILE_BYTES // blk_io)))
        if pl.cdiv(L, tl) == 1:
            tb = min(tb, max(1, pl.cdiv(Mpre, min_steps)))
        tb = min(tb, Mpre)
        grid = (pl.cdiv(Mpre, tb), pl.cdiv(L, tl))
        block = (tb, N, tl)
        index_map = lambda i, j: (i, 0, j)
        dims = ("parallel", "parallel")

    return pl.pallas_call(
        kernel,
        out_shape=jax.ShapeDtypeStruct(shape, out_dtype),
        grid_spec=pltpu.PrefetchScalarGridSpec(
            num_scalar_prefetch=0,
            grid=grid,
            in_specs=[pl.BlockSpec(block, index_map) for _ in args],
            out_specs=pl.BlockSpec(block, index_map),
        ),
        compiler_params=pltpu.CompilerParams(
            # TODO(synk): on v7x, profile whether "parallel" actually shards the
            # row axis across both TensorCores; if one core is idle, switch the
            # leading axis to pltpu.CORE_PARALLEL.
            dimension_semantics=dims,
            vmem_limit_bytes=hw["vmem_limit"],
        ),
    )(*args)


# ----------------------------------------------------------------------------
# Differentiable core (custom_vjp with fused Pallas backward)
# ----------------------------------------------------------------------------
def _similarity_impl(x, tau, hard, axis):
    kernel = functools.partial(_fwd_kernel, inv_tau=1.0 / tau, hard=hard, axis=axis)
    return _launch(kernel, (x,), x.dtype, axis)


@functools.partial(jax.custom_vjp, nondiff_argnums=(1, 2, 3))
def _similarity_core(x, tau, hard, axis):
    return _similarity_impl(x, tau, hard, axis)


def _similarity_core_fwd(x, tau, hard, axis):
    out = _similarity_impl(x, tau, hard, axis)
    # Soft path: residual is alpha itself (no recompute in bwd).
    # Hard path: output is the one-hot, so keep the logits and recompute alpha.
    return out, (x if hard else out)


def _similarity_core_bwd(tau, hard, axis, res, g):
    kernel = functools.partial(
        _bwd_kernel, inv_tau=1.0 / tau, res_is_logits=hard, axis=axis
    )
    dx = _launch(kernel, (res, g), res.dtype, axis)
    return (dx,)


_similarity_core.defvjp(_similarity_core_fwd, _similarity_core_bwd)


# ----------------------------------------------------------------------------
# Public wrapper (matches Similarity.forward)
# ----------------------------------------------------------------------------
def similarity(log_alpha, normalise_dim=-1, tau=0.2, hard=False):
    """Pallas implementation of Similarity.forward (differentiable)."""
    ndim = log_alpha.ndim
    axis = normalise_dim % ndim
    shape = log_alpha.shape

    if ndim >= 2 and axis == ndim - 2:
        # Sublane-reduction path: keep the original layout (no HBM transpose).
        mpre = math.prod(shape[:axis]) if axis > 0 else 1
        x3 = log_alpha.reshape(mpre, shape[axis], shape[-1])
        out = _similarity_core(x3, float(tau), bool(hard), -2)
        return out.reshape(shape)

    if axis != ndim - 1:
        # TODO(synk): axes other than the last two still pay a full HBM
        # transpose (moveaxis) on both input and output.
        x = jnp.moveaxis(log_alpha, axis, -1)
    else:
        x = log_alpha
    moved_shape = x.shape
    N = moved_shape[-1]
    M = max(1, math.prod(moved_shape[:-1]))
    x2 = x.reshape(M, N)

    if N % 128 == 0 or N >= 512:
        # Lane-dense already, or large enough that masked stores only hit the
        # last 128-lane group: no HBM pad/slice pass.
        out = _similarity_core(x2, float(tau), bool(hard), -1)
    else:
        # Small, non-lane-aligned N: pad lanes with a very negative value so
        # exp(pad - max) == 0; slice the padding off afterwards.
        npad = _round_up(N, 128)
        x2p = jnp.pad(x2, ((0, 0), (0, npad - N)), constant_values=_NEG_BIG)
        out = _similarity_core(x2p, float(tau), bool(hard), -1)[:, :N]

    out = out.reshape(moved_shape)
    if axis != ndim - 1:
        out = jnp.moveaxis(out, -1, axis)
    return out


# ----------------------------------------------------------------------------
# Reference + self-test
# ----------------------------------------------------------------------------
def _reference(log_alpha, normalise_dim=-1, tau=0.2, hard=False):
    x = log_alpha / tau
    alpha = jnp.exp(
        x - jax.scipy.special.logsumexp(x, axis=normalise_dim, keepdims=True)
    )
    if hard:
        idx = jnp.argmax(alpha, axis=normalise_dim, keepdims=True)
        iota = jax.lax.broadcasted_iota(
            jnp.int32, alpha.shape, normalise_dim % alpha.ndim
        )
        alpha_hard = (iota == idx).astype(alpha.dtype)
        return alpha_hard - jax.lax.stop_gradient(alpha) + alpha
    return alpha


if __name__ == "__main__":
    key = jax.random.PRNGKey(0)
    k1, k2, k3 = jax.random.split(key, 3)

    # Permutation-network style logits: (batch=2, n=16, n=16), softmax over last dim.
    log_alpha = jax.random.normal(k1, (2, 16, 16), dtype=jnp.float32)

    # Soft (default) path.
    out_soft = jax.block_until_ready(
        similarity(log_alpha, normalise_dim=-1, tau=0.2, hard=False)
    )
    ref_soft = _reference(log_alpha, normalise_dim=-1, tau=0.2, hard=False)
    assert out_soft.shape == log_alpha.shape
    assert jnp.allclose(out_soft, ref_soft, atol=1e-5, rtol=1e-5)

    # Hard (straight-through) path.
    out_hard = jax.block_until_ready(
        similarity(log_alpha, normalise_dim=-1, tau=0.2, hard=True)
    )
    ref_hard = _reference(log_alpha, normalise_dim=-1, tau=0.2, hard=True)
    assert jnp.allclose(out_hard, ref_hard, atol=1e-5, rtol=1e-5)
    assert jnp.allclose(jnp.sum(out_hard, axis=-1), 1.0, atol=1e-5)

    # Lane-dense case (N == 128, no padding, ragged-M grid).
    xb = jax.random.normal(k2, (4, 8, 128), dtype=jnp.float32)
    outb = jax.block_until_ready(similarity(xb, normalise_dim=-1, tau=0.2, hard=False))
    assert jnp.allclose(outb, _reference(xb, -1, 0.2, False), atol=1e-5, rtol=1e-5)

    # Second-to-last normalise_dim: sublane-reduction path (no moveaxis).
    xc = jax.random.normal(k3, (2, 128, 8), dtype=jnp.float32)
    outc = jax.block_until_ready(similarity(xc, normalise_dim=1, tau=0.2, hard=False))
    assert jnp.allclose(outc, _reference(xc, 1, 0.2, False), atol=1e-5, rtol=1e-5)
    outch = jax.block_until_ready(similarity(xc, normalise_dim=1, tau=0.2, hard=True))
    assert jnp.allclose(outch, _reference(xc, 1, 0.2, True), atol=1e-5, rtol=1e-5)

    # Gradients through the fused Pallas backward (soft and straight-through).
    w = jax.random.normal(k2, log_alpha.shape, dtype=jnp.float32)
    for hard in (False, True):
        g_ker = jax.grad(lambda t: jnp.sum(similarity(t, -1, 0.2, hard) * w))(log_alpha)
        g_ref = jax.grad(lambda t: jnp.sum(_reference(t, -1, 0.2, hard) * w))(log_alpha)
        g_ker = jax.block_until_ready(g_ker)
        assert jnp.allclose(g_ker, g_ref, atol=1e-4, rtol=1e-4)

    # Gradient through the sublane-reduction path.
    wc = jax.random.normal(k3, xc.shape, dtype=jnp.float32)
    gc_ker = jax.grad(lambda t: jnp.sum(similarity(t, 1, 0.2, False) * wc))(xc)
    gc_ref = jax.grad(lambda t: jnp.sum(_reference(t, 1, 0.2, False) * wc))(xc)
    gc_ker = jax.block_until_ready(gc_ker)
    assert jnp.allclose(gc_ker, gc_ref, atol=1e-4, rtol=1e-4)

    print("KERNEL_OK")
</pallas_src>

<mosaic_0001>
module attributes {stable_mosaic.version = 11 : i64} {
  func.func @_fwd_kernel(%arg0: i32, %arg1: memref<16x128xf32, #tpu.memory_space<vmem>>, %arg2: memref<16x128xf32, #tpu.memory_space<vmem>>) attributes {dimension_semantics = [#tpu.dimension_semantics<parallel>], iteration_bounds = array<i64: 2>, scalar_prefetch = 0 : i64, scratch_operands = 0 : i64, tpu.core_type = #tpu.core_type<tc>, window_params = [{transform_indices = @transform_0, window_bounds = array<i64: 16, 128>}, {transform_indices = @transform_1, window_bounds = array<i64: 16, 128>}]} {
    %c0 = arith.constant 0 : index
    %c0_0 = arith.constant 0 : index
    %0 = vector.load %arg1[%c0, %c0_0] : memref<16x128xf32, #tpu.memory_space<vmem>>, vector<16x128xf32>
    %cst = arith.constant 5.000000e+00 : f32
    %1 = vector.broadcast %cst : f32 to vector<16x128xf32>
    %2 = arith.mulf %0, %1 : vector<16x128xf32>
    %cst_1 = arith.constant dense<0xFF800000> : vector<16xf32>
    %3 = vector.multi_reduction <maximumf>, %2, %cst_1 [1] : vector<16x128xf32> to vector<16xf32>
    %4 = vector.shape_cast %3 : vector<16xf32> to vector<16x1xf32>
    %5 = vector.broadcast %4 : vector<16x1xf32> to vector<16x128xf32>
    %6 = arith.subf %2, %5 : vector<16x128xf32>
    %7 = math.exp %6 : vector<16x128xf32>
    %cst_2 = arith.constant dense<0.000000e+00> : vector<16xf32>
    %8 = vector.multi_reduction <add>, %7, %cst_2 [1] : vector<16x128xf32> to vector<16xf32>
    %9 = vector.shape_cast %8 : vector<16xf32> to vector<16x1xf32>
    %10 = tpu.reciprocal %9 : vector<16x1xf32> -> vector<16x1xf32>
    %11 = vector.broadcast %4 : vector<16x1xf32> to vector<16x128xf32>
    %12 = arith.subf %2, %11 : vector<16x128xf32>
    %13 = math.exp %12 : vector<16x128xf32>
    %14 = vector.broadcast %10 : vector<16x1xf32> to vector<16x128xf32>
    %15 = arith.mulf %13, %14 : vector<16x128xf32>
    %c0_3 = arith.constant 0 : index
    %c0_4 = arith.constant 0 : index
    %16 = vector.load %arg2[%c0_3, %c0_4] : memref<16x128xf32, #tpu.memory_space<vmem>>, vector<16x128xf32>
    tpu.vector_store %arg2[%c0_3, %c0_4], %15 {strides = array<i32>} : memref<16x128xf32, #tpu.memory_space<vmem>>, vector<16x128xf32>,
    return
  }
  func.func @transform_0(%arg0: i32) -> (i32, i32) {
    %c0_i32 = arith.constant 0 : i32
    %c0_i32_0 = arith.constant 0 : i32
    return %arg0, %c0_i32 : i32, i32
  }
  func.func @transform_1(%arg0: i32) -> (i32, i32) {
    %c0_i32 = arith.constant 0 : i32
    %c0_i32_0 = arith.constant 0 : i32
    return %arg0, %c0_i32 : i32, i32
  }
}

</mosaic_0001>

<bundles_post_ra>
// kernel: tpu_custom_call.1
= control target key start
LH: loop header
LB: loop body
LE: loop exit
PB: predicated region body
PF: predicated region fallthrough
CT: control target
= control target key end

     0   :  { %6 = vsyncpa [#allocation3], 0  ;;  %s595_s0 = inlined_call_operand.hbm [shape: f32[32,128], index: 0, kind: input, shape index: {}]   ;;  %s596_s1 = inlined_call_operand.hbm [shape: f32[32,128], index: 1, kind: output, shape index: {}]  }
   0x1   :  { %8 = vsyncpa [#allocation3 + $0x1], 0 }
   0x2   :  { %9 = vsyncpa [#allocation4], 0 }
   0x3   :  { %11 = vsyncpa [#allocation4 + $0x1], 0  ;;  %s464_s6 = smov 0   ;;  %s466_s7 = smov 0  }
   0x4   :  { %s468_s8 = smov 0   ;;  %s470_s9 = smov 0  }
   0x5 LB: > { %s485_s10 = sadd.s32 4294967295, %s448_s9   ;;  %s278_s11 = sadd.s32 4294967294, %s448_s9   ;;  %s448_s9 = sphi %s470_s9, %s606_s9   ;;  %s444_s8 = sphi %s468_s8, %s605_s8   ;;  %s440_s7 = sphi %s466_s7, %s604_s7   ;;  %s436_s6 = sphi %s464_s6, %s603_s6  }
   0x6   : > { %s489_s12 = sadd.s32 1, %s448_s9   ;;  %s24_s13 = sadd.s32 1, %s444_s8 }
   0x7   : > { %s21_s14 = ssub.s32 %s448_s9, %s489_s12  ;;  %p31_p0 = scmp.ne.s32.totalorder %s444_s8, %s440_s7 }
   0x8   : > { %p22_p1 = scmp.eq.s32.totalorder %s21_s14, 0  ;;  %p32_p2 = scmp.eq.s32.totalorder %s448_s9, 0 }
   0x9   : > { %p37_p3 = scmp.ne.s32.totalorder %s440_s7, %s436_s6  ;;  %p38_p4 = scmp.eq.s32.totalorder %s485_s10, 0 }
   0xa   : > { %s501_s15 = scalar_select %p22_p1, %s444_s8, %s24_s13  }
   0xb   : > { %p503_p5 = por %p32_p2, %p31_p0  ;;  %p507_p6 = por %p38_p4, %p37_p3 }
   0xc   : > { %p61_p7 = scmp.eq.s32.totalorder %s485_s10, 1  ;;  %p67_p8 = scmp.eq.s32.totalorder %s278_s11, 1 }
   0xd   : > { %p306_p10 = scmp.lt.s32.totalorder %s448_s9, 2  ;;  %s87_s20 = sand.u32 1, %s444_s8  }
   0xe   : > { %p514_p11 = por %p61_p7, %p31_p0  ;;  %p518_p12 = por %p67_p8, %p37_p3 }
   0xf   : > { %s292_s21 = sshll.u32 %s448_s9, 4  ;;  %s281_s22 = sshll.u32 %s87_s20, 4 }
  0x10   : > { %s96_s25 = scalar_lea.hbm %s595_s0, %s292_s21  ;;  %s91_s27 = scalar_lea.vmem [#allocation2], %s281_s22 }
  0x11   : > { %s97_s26 = sshll.u32 %s96_s25, 4  ;;  %s99_s28 = sshll.u32 %s91_s27, 4  ;;  %s98_s26 = int_to_ptr.hbm [resolvable:$true] %s97_s26  ;;  %s100_s28 = int_to_ptr.vmem [resolvable:$true] %s99_s28 }
  0x12   : > { %p529_p13 = pnand %p306_p10, %p503_p5  ;;  %p284_p0 = scmp.ge.s32.totalorder %s448_s9, 1 }
  0x13   : > { %p107_p1 = scmp.lt.s32.totalorder %s448_s9, 3  ;;  %s88_s30 = scalar_lea.sflag [#allocation3], %s87_s20 }
  0x14   : > { %s352_s2 = sshra.s32 %s98_s26, 4  ;;  %p356_p3 = pneg %p529_p13  ;;  %s353_s2 = int_to_ptr.hbm [resolvable:$true] %s352_s2 }
  0x15   : > { %s354_s3 = scalar_lea.hbm %s353_s2, 16  ;;  %s359_s11 = scalar_lea.hbm %s595_s0, 32 }
  0x16   : > { %p355_p2 = scmp.ne.s32.totalorder %s353_s2, %s354_s3  ;;  %p360_p5 = scmp.lt.s32.totalorder %s353_s2, %s595_s0 }
  0x17   : > { %p361_p8 = scmp.lt.s32.totalorder %s359_s11, %s354_s3 }
  0x18   : > { %p357_p4 = pnand %p356_p3, %p355_p2 }
  0x19   : > { %p362_p10 = por %p361_p8, %p360_p5 }
  0x1a   : > { %p358_p7 = pneg %p357_p4 }
  0x1c   : > { %p363_p9 = pnand %p362_p10, %p358_p7 }
  0x1e   : > { %366 = shalt.err (!%p363_p9)
}
  0x1f   : > { %s450_s16 = smov 128   ;;  %s451_s20 = smov 8  }
  0x20   : > { %301 = dma.hbm_to_vmem [thread:$0]  (!%p529_p13), %s98_s26, 256, %s100_s28, %s88_s30, %s450_s16, %s450_s16, %s451_s20  }
  0x21   : > { %p108_p2 = pnand %p284_p0, %p107_p1 }
  0x22   : > { %s550_s21 = sand.u32 (!%p108_p2), 1, %s440_s7  }
  0x23   : > { %111 = sbr.rel (%p108_p2) target bundleno = 318 (0x13e), region = 24  ;;  %s285_s22 = sshll.u32 (!%p108_p2), %s550_s21, 4 }
  0x24   : > { %s114_s23 = scalar_lea.sflag (!%p108_p2), [#allocation3], %s550_s21  ;;  %s117_s24 = scalar_lea.vmem (!%p108_p2), [#allocation2], %s285_s22 }
  0x28   : > { %427 = dma.done.wait (%p507_p6), %s114_s23, 256  }
  0x29   : > { %429 = vsyncadd (%p507_p6), %s114_s23, 4294967040  ;;  %v139_v0 = vld [vmem:[%s117_s24] sm:$0xff]  ;;  %v140_v2 = vld [vmem:[%s117_s24 + $0x8] sm:$0xff]  ;;  %s293_s17 = sshll.u32 %s485_s10, 4  ;;  %s136_s28 = scalar_lea.vmem [#allocation5], %s285_s22 }
  0x2a   : > { %v141_v1 = vmul.f32 5.0, %v139_v0  ;;  %v142_v3 = vmul.f32 5.0, %v140_v2  ;;  %s201_s27 = scalar_lea.hbm %s596_s1, %s293_s17  ;;  %s202_s29 = sshll.u32 %s136_s28, 4  ;;  %s203_s29 = int_to_ptr.vmem [resolvable:$true] %s202_s29 }
  0x2b   : > { %s204_s10 = sshll.u32 %s201_s27, 4  ;;  %s190_s30 = scalar_lea.sflag [#allocation4], %s550_s21  ;;  %s205_s10 = int_to_ptr.hbm [resolvable:$true] %s204_s10 }
  0x2c   : > { %143 = vmax.xlane.f32.xlu0 %v141_v1  ;;  %s396_s2 = sshra.s32 %s205_s10, 4  ;;  %s402_s11 = scalar_lea.hbm %s596_s1, 32  ;;  %s397_s2 = int_to_ptr.hbm [resolvable:$true] %s396_s2 }
  0x2d   : > { %s398_s3 = scalar_lea.hbm %s397_s2, 16  ;;  %p403_p0 = scmp.lt.s32.totalorder %s397_s2, %s596_s1 }
  0x2e   : > { %p399_p6 = scmp.ne.s32.totalorder %s397_s2, %s398_s3  ;;  %p404_p1 = scmp.lt.s32.totalorder %s402_s11, %s398_s3 }
  0x30   : > { %p400_p9 = pnand %p399_p6, %p514_p11  ;;  %p405_p3 = por %p404_p1, %p403_p0 }
  0x32   : > { %p401_p13 = pneg %p400_p9 }
  0x34   : > { %145 = vmax.xlane.f32.xlu0 %v142_v3  ;;  %p406_p4 = pnand %p405_p3, %p401_p13 }
  0x9f   : > { %v144_v4 = vpop.xlane.xlu0 %143 }
  0xa0   : > { %v147_v5 = vsub.f32 %v141_v1, %v144_v4 }
  0xa2   : > { %v149_v6 = vmul.f32 1.442695, %v147_v5 }
  0xa4   : > { %344 = vpow2.f32 %v149_v6 }
  0xa7   : > { %v146_v7 = vpop.xlane.xlu0 %145 }
  0xa8   : > { %v148_v8 = vsub.f32 %v142_v3, %v146_v7 }
  0xaa   : > { %v345_v9 = vpop.eup %344  ;;  %v151_v10 = vmul.f32 1.442695, %v148_v8 }
  0xab   : > { %153 = vadd.xlane.f32.xlu1 %v345_v9 }
  0xac   : > { %346 = vpow2.f32 %v151_v10 }
  0xb2   : > { %v347_v11 = vpop.eup %346 }
  0xb3   : > { %155 = vadd.xlane.f32.xlu1 %v347_v11 }
 0x11e   : > { %v154_v12 = vpop.xlane.xlu1 %153 }
 0x11f   : > { %348 = vrcp.f32 %v154_v12  ;;  %v168_v17 = vand.u32 2147483648, %v154_v12  ;;  %v166_v19 = vand.u32 2147483647, %v154_v12  ;;  %vm162_vm1 = vweird.f32 %v154_v12 }
 0x121   : > { %v169_v22 = vor.u32 1.1754944e-38, %v168_v17  ;;  %vm167_vm3 = vcmp.eq.f32.partialorder %v166_v19, 8.507059e+37 }
 0x125   : > { %v349_v13 = vpop.eup %348 }
 0x126   : > { %v158_v14 = vmul.f32 %v349_v13, %v154_v12  ;;  %v156_v15 = vpop.xlane.xlu1 %155  ;;  %vm163_vm0 = vweird.f32 %v349_v13 }
 0x127   : > { %350 = vrcp.f32 %v156_v15  ;;  %vm164_vm2 = vmor %vm162_vm1, %vm163_vm0  ;;  %v182_v28 = vand.u32 2147483648, %v156_v15  ;;  %v180_v30 = vand.u32 2147483647, %v156_v15  ;;  %vm176_vm5 = vweird.f32 %v156_v15 }
 0x128   : > { %v159_v16 = vsub.f32 1.0, %v158_v14 }
 0x129   : > { %v183_v32 = vor.u32 1.1754944e-38, %v182_v28  ;;  %vm181_vm7 = vcmp.eq.f32.partialorder %v180_v30, 8.507059e+37 }
 0x12a   : > { %v160_v18 = vmul.f32 %v349_v13, %v159_v16 }
 0x12c   : > { %v161_v20 = vadd.f32 %v349_v13, %v160_v18 }
 0x12d   : > { %v351_v21 = vpop.eup %350 }
 0x12e   : > { %v165_v23 = vsel %vm164_vm2, %v349_v13, %v161_v20  ;;  %v172_v24 = vmul.f32 %v351_v21, %v156_v15  ;;  %vm177_vm4 = vweird.f32 %v351_v21 }
 0x12f   : > { %v170_v25 = vsel %vm167_vm3, %v169_v22, %v165_v23  ;;  %vm178_vm6 = vmor %vm176_vm5, %vm177_vm4 }
 0x130   : > { %v185_v26 = vmul.f32 %v345_v9, %v170_v25  ;;  %v173_v27 = vsub.f32 1.0, %v172_v24 }
 0x132   : > { %v174_v29 = vmul.f32 %v351_v21, %v173_v27  ;;  %187 = vst [vmem:[%s136_s28] sm:$0xff] %v185_v26 }
 0x134   : > { %v175_v31 = vadd.f32 %v351_v21, %v174_v29 }
 0x136   : > { %v179_v33 = vsel %vm178_vm6, %v351_v21, %v175_v31 }
 0x137   : > { %v184_v34 = vsel %vm181_vm7, %v183_v32, %v179_v33 }
 0x138   : > { %v186_v35 = vmul.f32 %v347_v11, %v184_v34 }
 0x13a   : > { %188 = vst [vmem:[%s136_s28 + $0x8] sm:$0xff] %v186_v35 }
 0x13b   : > { %409 = shalt.err (!%p406_p4)
}
 0x13c   : > { %s452_s16 = smov 128   ;;  %s453_s20 = smov 8  }
 0x13d   : > { %296 = dma.vmem_to_hbm [thread:$0]  (%p514_p11), %s203_s29, 256, %s205_s10, %s190_s30, %s452_s16, %s452_s16, %s453_s20  }
 0x13e PF: > { %s219_s21 = sand.u32 1, %s436_s6   ;;  %p602_p7 = scmp.ge.s32.totalorder %s448_s9, 2 }
 0x13f   : > { %s220_s22 = scalar_lea.sflag [#allocation4], %s219_s21 }
 0x140   : > { %p303_p5 = pnand %p602_p7, %p518_p12 }
 0x142   : > { %p304_p8 = pneg %p303_p5 }
 0x144   : > { %431 = dma.done.wait (%p304_p8), %s220_s22, 256  }
 0x145   : > { %433 = vsyncadd (%p304_p8), %s220_s22, 4294967040  ;;  %p14_p10 = scmp.ge.s32.totalorder %s489_s12, 4   ;;  %s603_s6 = smov %s440_s7 }
 0x146   : > { %s604_s7 = smov %s444_s8  ;;  %s605_s8 = smov %s501_s15 }
 0x147   : > { %s606_s9 = smov %s489_s12  ;;  %16 = sbr.rel (!%p14_p10) target bundleno = 5 (0x5), region = 69 }
 0x14c   :  { %226 = vsyncpa [#allocation3], 1 }
 0x14d   :  { %228 = vsyncpa [#allocation3 + $0x1], 1 }
 0x14e   :  { %229 = vsyncpa [#allocation4], 1 }
 0x14f   :  { %231 = vsyncpa [#allocation4 + $0x1], 1 }

</bundles_post_ra>
